<compile_context>
chip_gen: v7x
topology: tpu7x:2x2x1
jax: 0.10.0
libtpu: 0.0.40
codegen_flags: <defaults>
</compile_context>

<pallas_src>
import jax
import jax.numpy as jnp
from jax.experimental import pallas as pl
from jax.experimental.pallas import tpu as pltpu

KSIZE = 3  # Conv1d kernel size


# ------------------------------- Pallas kernels ------------------------------- #

def bn_stats_kernel(x_ref, sum_ref, sq_ref):
    """Accumulates per-channel sum / sum-of-squares over the batch-tile grid.

    x_ref   : (TB, C_in, L)  input tile, native dtype
    sum_ref : (C_in, 1) f32  resident accumulator (constant output index_map)
    sq_ref  : (C_in, 1) f32
    """
    @pl.when(pl.program_id(0) == 0)
    def _():
        sum_ref[...] = jnp.zeros_like(sum_ref)
        sq_ref[...] = jnp.zeros_like(sq_ref)

    x = x_ref[...].astype(jnp.float32)
    sum_ref[...] += jnp.sum(jnp.sum(x, axis=2, keepdims=True), axis=0)
    sq_ref[...] += jnp.sum(jnp.sum(x * x, axis=2, keepdims=True), axis=0)


def basic_block_kernel(x_ref, scale_ref, shift_ref, w_ref, o_ref):
    """One grid step processes TB batch elements.

    x_ref     : (TB, C_in, L)           input tile, native dtype
    scale_ref : (C_in, 1) f32           folded BN scale = gamma / sqrt(var + eps)
    shift_ref : (C_in, 1) f32           folded BN shift = beta - mean * scale
    w_ref     : (3, C_out, C_in) bf16   conv weight, tap-major (w_ref[k] = conv_w[:, :, k])
    o_ref     : (TB, C_in + C_out, L)   output tile = [x ; conv_out] along channels
    """
    tb, c_in, L = x_ref.shape
    c_out = w_ref.shape[1]

    x = x_ref[...]
    scale = scale_ref[...][None]     # (1, C_in, 1), broadcasts over (TB, ., L)
    shift = shift_ref[...][None]

    # Pass-through half of the channel concat: one aligned coalesced store.
    o_ref[:, :c_in, :] = x.astype(o_ref.dtype)

    # BatchNorm (folded) + ReLU in f32, then a single bf16 cast shared by all taps.
    y32 = jnp.maximum(x.astype(jnp.float32) * scale + shift, 0.0)
    y = y32.astype(jnp.bfloat16)                                             # (TB, C_in, L)

    # Conv zero padding (padding=1): lane-index masks on the XLU-rolled views.
    lane = jax.lax.broadcasted_iota(jnp.int32, (1, 1, L), 2)
    prev = jnp.where(lane == 0, 0.0, pltpu.roll(y, shift=1, axis=2))         # y[:, :, l-1]
    nxt = jnp.where(lane == L - 1, 0.0, pltpu.roll(y, shift=L - 1, axis=2))  # y[:, :, l+1]

    # K=3 conv = 3 accumulating batched MXU contractions over the whole tile (no im2col
    # concat buffer).  MXU has huge slack at these shapes; kernel is HBM-bound.
    # TODO(synk): feed f32 taps/weights here if tighter-than-bf16 accuracy is required
    # (costs no wall time at these shapes).
    acc = jnp.zeros((tb, c_out, L), jnp.float32)
    for k, tap in enumerate((prev, y, nxt)):                                 # static K=3
        wk = jnp.broadcast_to(w_ref[k][None], (tb, c_out, c_in))             # bf16
        acc = acc + jnp.einsum('boc,bcl->bol', wk, tap,
                               preferred_element_type=jnp.float32)

    # One coalesced lane-dense store for the conv half.
    o_ref[:, c_in:, :] = acc.astype(o_ref.dtype)


# ------------------------- generation-aware tile selection ------------------------- #

def _tpu_vmem_capacity_bytes():
    """Best-effort per-TensorCore VMEM capacity; conservative fallback = v7x (64 MiB)."""
    try:
        return int(pltpu.get_tpu_info().vmem_capacity_bytes)
    except Exception:
        return 64 << 20


def _num_tensorcores_per_chip():
    """Best-effort count of TensorCores the ('parallel',) grid axis is sharded across."""
    try:
        kind = jax.devices()[0].device_kind.lower()
    except Exception:
        return 1
    return 2 if any(t in kind for t in ("v7", "7x", "v4", "v5p")) else 1


def _main_vmem_bytes(tb, c_in, c_out, L, io_itemsize):
    x_buf = 2 * tb * c_in * L * io_itemsize                   # double-buffered input tile
    o_buf = 2 * tb * (c_in + c_out) * L * io_itemsize         # double-buffered output tile
    params = 2 * (KSIZE * c_out * c_in * 2 + 2 * c_in * 4)    # weight + scale/shift buffers
    live = tb * L * (4 * c_in                                  # y32 (f32)
                     + 2 * 3 * c_in                            # bf16 taps (prev / y / nxt)
                     + 4 * c_out)                              # f32 conv accumulator
    return x_buf + o_buf + params + live


def _pick_batch_tile(n, fits, num_tc):
    divisors = [d for d in range(1, n + 1) if n % d == 0]
    fitting = [d for d in divisors if fits(d)] or [1]
    if num_tc > 1:
        # v7x: keep every TensorCore busy and balanced (>= num_tc steps, count a multiple).
        balanced = [d for d in fitting if (n // d) >= num_tc and (n // d) % num_tc == 0]
        if balanced:
            return max(balanced)
    # Single-TC chips (v5e/v6e): fewer, larger steps amortize the ~0.35us/step overhead.
    return max(fitting)


# ----------------------------------- wrapper ----------------------------------- #

def basic_block_forward(x, gamma, beta, conv_w, eps=1e-5, drop_rate=0.0, batch_tile=None):
    """x: (N, C_in, L).  Returns (N, C_in + C_out, L) = concat([x, conv(relu(bn(x)))], ch)."""
    if drop_rate != 0.0:
        # TODO(synk): dropout path (drop_rate > 0) not implemented.
        raise NotImplementedError("drop_rate > 0 is not supported by this kernel")

    N, C_in, L = x.shape
    C_out = conv_w.shape[0]
    assert conv_w.shape == (C_out, C_in, KSIZE)

    io_sz = jnp.dtype(x.dtype).itemsize
    vmem_cap = _tpu_vmem_capacity_bytes()
    num_tc = _num_tensorcores_per_chip()
    budget = vmem_cap // 3  # headroom for compiler scratch / pipelining

    tb = batch_tile if batch_tile is not None else _pick_batch_tile(
        N, lambda d: _main_vmem_bytes(d, C_in, C_out, L, io_sz) <= budget, num_tc)
    assert N % tb == 0, (N, tb)
    footprint = _main_vmem_bytes(tb, C_in, C_out, L, io_sz)
    vmem_limit = int(min(vmem_cap * 3 // 4, max(2 * footprint, 16 << 20)))

    # ---- Pass 1: training-mode BN batch statistics as a Pallas reduction pre-pass. ----
    # x is read in its native dtype; no materialized f32 copy of x in HBM.
    stats_cost = pl.CostEstimate(
        flops=3 * N * C_in * L, transcendentals=0,
        bytes_accessed=N * C_in * L * io_sz + 2 * C_in * 4)
    x_sum, x_sq = pl.pallas_call(
        bn_stats_kernel,
        out_shape=(jax.ShapeDtypeStruct((C_in, 1), jnp.float32),
                   jax.ShapeDtypeStruct((C_in, 1), jnp.float32)),
        grid=(N // tb,),
        in_specs=[pl.BlockSpec((tb, C_in, L), lambda n: (n, 0, 0))],
        out_specs=(pl.BlockSpec((C_in, 1), lambda n: (0, 0)),
                   pl.BlockSpec((C_in, 1), lambda n: (0, 0))),
        compiler_params=pltpu.CompilerParams(
            dimension_semantics=("arbitrary",), vmem_limit_bytes=vmem_limit),
        cost_estimate=stats_cost,
    )(x)

    # Fold BN (biased training-mode variance, like the PyTorch forward) into scale/shift.
    cnt = float(N * L)
    mean = x_sum / cnt                                           # (C_in, 1)
    var = jnp.maximum(x_sq / cnt - mean * mean, 0.0)
    inv = gamma.astype(jnp.float32).reshape(C_in, 1) / jnp.sqrt(var + eps)
    scale = inv
    shift = beta.astype(jnp.float32).reshape(C_in, 1) - mean * inv

    # Conv weight tap-major, bf16 for the MXU: (C_out, C_in, 3) -> (3, C_out, C_in).
    w3 = jnp.transpose(conv_w, (2, 0, 1)).astype(jnp.bfloat16)

    cost = pl.CostEstimate(
        flops=2 * N * C_out * KSIZE * C_in * L,
        transcendentals=0,
        bytes_accessed=(N * C_in * L * io_sz                     # x read (native dtype)
                        + KSIZE * C_out * C_in * 2               # bf16 weight
                        + 2 * C_in * 4                           # scale/shift
                        + N * (C_in + C_out) * L * io_sz))       # output write

    # ---- Pass 2: fused BN + ReLU + Conv1d + channel concat. ----
    # TODO(synk): for production shapes with L >> 128, additionally tile L in 512-1024 lane
    # chunks (same roll+mask halo handling per L-tile).
    out = pl.pallas_call(
        basic_block_kernel,
        out_shape=jax.ShapeDtypeStruct((N, C_in + C_out, L), x.dtype),
        grid=(N // tb,),
        in_specs=[
            pl.BlockSpec((tb, C_in, L), lambda n: (n, 0, 0)),
            pl.BlockSpec((C_in, 1), lambda n: (0, 0)),
            pl.BlockSpec((C_in, 1), lambda n: (0, 0)),
            pl.BlockSpec((KSIZE, C_out, C_in), lambda n: (0, 0, 0)),
        ],
        out_specs=pl.BlockSpec((tb, C_in + C_out, L), lambda n: (n, 0, 0)),
        compiler_params=pltpu.CompilerParams(
            dimension_semantics=("parallel",), vmem_limit_bytes=vmem_limit),
        cost_estimate=cost,
    )(x, scale, shift, w3)

    return out


# ----------------------------------- reference ----------------------------------- #

def reference_forward(x, gamma, beta, conv_w, eps=1e-5):
    """Pure-JAX (f32) reference mirroring the PyTorch forward (training-mode BN)."""
    mean = jnp.mean(x, axis=(0, 2), keepdims=True)
    var = jnp.mean((x - mean) ** 2, axis=(0, 2), keepdims=True)
    y = (x - mean) / jnp.sqrt(var + eps) * gamma[None, :, None] + beta[None, :, None]
    y = jnp.maximum(y, 0.0)
    yp = jnp.pad(y, ((0, 0), (0, 0), (1, 1)))
    L = x.shape[2]
    out = jnp.zeros((x.shape[0], conv_w.shape[0], L), jnp.float32)
    for k in range(KSIZE):
        out = out + jnp.einsum('oc,ncl->nol', conv_w[:, :, k], yp[:, :, k:k + L])
    return jnp.concatenate([x, out.astype(x.dtype)], axis=1)


if __name__ == "__main__":
    key = jax.random.PRNGKey(0)
    k1, k2, k3, k4 = jax.random.split(key, 4)

    # TPU-friendly small shapes: C_in multiple of 8 (sublane), L multiple of 128 (lane).
    N, C_in, C_out, L = 8, 8, 16, 128

    x = jax.random.normal(k1, (N, C_in, L), dtype=jnp.float32)
    gamma = 1.0 + 0.1 * jax.random.normal(k2, (C_in,), dtype=jnp.float32)
    beta = 0.1 * jax.random.normal(k3, (C_in,), dtype=jnp.float32)
    conv_w = jax.random.normal(k4, (C_out, C_in, KSIZE), dtype=jnp.float32) / jnp.sqrt(C_in * KSIZE)

    out = jax.block_until_ready(basic_block_forward(x, gamma, beta, conv_w))
    ref = reference_forward(x, gamma, beta, conv_w)

    assert out.shape == (N, C_in + C_out, L), out.shape
    # Pass-through channels must be a bit-exact copy of x.
    assert jnp.array_equal(out[:, :C_in, :], x)
    # Conv channels use bf16 MXU inputs with an f32 accumulator -> loose tolerance vs f32 ref.
    err = float(jnp.max(jnp.abs(out[:, C_in:, :] - ref[:, C_in:, :])))
    assert jnp.allclose(out[:, C_in:, :], ref[:, C_in:, :], atol=5e-2, rtol=5e-2), err

    print("KERNEL_OK")
</pallas_src>

<mosaic_0001>
module attributes {stable_mosaic.version = 11 : i64} {
  func.func @bn_stats_kernel(%arg0: i32, %arg1: memref<8x8x128xf32, #tpu.memory_space<vmem>>, %arg2: memref<8x1xf32, #tpu.memory_space<vmem>>, %arg3: memref<8x1xf32, #tpu.memory_space<vmem>>) attributes {dimension_semantics = [#tpu.dimension_semantics<arbitrary>], iteration_bounds = array<i64: 1>, scalar_prefetch = 0 : i64, scratch_operands = 0 : i64, tpu.core_type = #tpu.core_type<tc>, window_params = [{transform_indices = @transform_0, window_bounds = array<i64: 8, 8, 128>}, {pipeline_mode = #tpu.pipeline_mode<synchronous>, transform_indices = @transform_1, window_bounds = array<i64: 8, 1>}, {pipeline_mode = #tpu.pipeline_mode<synchronous>, transform_indices = @transform_2, window_bounds = array<i64: 8, 1>}]} {
    %c0_i32 = arith.constant 0 : i32
    %0 = arith.cmpi eq, %arg0, %c0_i32 : i32
    %1 = arith.extui %0 : i1 to i32
    %c0_i32_0 = arith.constant 0 : i32
    %2 = arith.cmpi ne, %1, %c0_i32_0 : i32
    scf.if %2 {
      %cst_14 = arith.constant 0.000000e+00 : f32
      %17 = vector.broadcast %cst_14 : f32 to vector<8x1xf32>
      %c0_15 = arith.constant 0 : index
      %c0_16 = arith.constant 0 : index
      %18 = vector.load %arg2[%c0_15, %c0_16] : memref<8x1xf32, #tpu.memory_space<vmem>>, vector<8x1xf32>
      tpu.vector_store %arg2[%c0_15, %c0_16], %17 {strides = array<i32>} : memref<8x1xf32, #tpu.memory_space<vmem>>, vector<8x1xf32>,
      %cst_17 = arith.constant 0.000000e+00 : f32
      %19 = vector.broadcast %cst_17 : f32 to vector<8x1xf32>
      %c0_18 = arith.constant 0 : index
      %c0_19 = arith.constant 0 : index
      %20 = vector.load %arg3[%c0_18, %c0_19] : memref<8x1xf32, #tpu.memory_space<vmem>>, vector<8x1xf32>
      tpu.vector_store %arg3[%c0_18, %c0_19], %19 {strides = array<i32>} : memref<8x1xf32, #tpu.memory_space<vmem>>, vector<8x1xf32>,
    } else {
    }
    %c0 = arith.constant 0 : index
    %c0_1 = arith.constant 0 : index
    %c0_2 = arith.constant 0 : index
    %3 = vector.load %arg1[%c0, %c0_1, %c0_2] : memref<8x8x128xf32, #tpu.memory_space<vmem>>, vector<8x8x128xf32>
    %c0_3 = arith.constant 0 : index
    %c0_4 = arith.constant 0 : index
    %4 = vector.load %arg2[%c0_3, %c0_4] : memref<8x1xf32, #tpu.memory_space<vmem>>, vector<8x1xf32>
    %cst = arith.constant dense<0.000000e+00> : vector<8x8xf32>
    %5 = vector.multi_reduction <add>, %3, %cst [2] : vector<8x8x128xf32> to vector<8x8xf32>
    %6 = vector.shape_cast %5 : vector<8x8xf32> to vector<8x8x1xf32>
    %cst_5 = arith.constant dense<0.000000e+00> : vector<8x1xf32>
    %7 = vector.multi_reduction <add>, %6, %cst_5 [0] : vector<8x8x1xf32> to vector<8x1xf32>
    %8 = arith.addf %4, %7 : vector<8x1xf32>
    %c0_6 = arith.constant 0 : index
    %c0_7 = arith.constant 0 : index
    %9 = vector.load %arg2[%c0_6, %c0_7] : memref<8x1xf32, #tpu.memory_space<vmem>>, vector<8x1xf32>
    tpu.vector_store %arg2[%c0_6, %c0_7], %8 {strides = array<i32>} : memref<8x1xf32, #tpu.memory_space<vmem>>, vector<8x1xf32>,
    %c0_8 = arith.constant 0 : index
    %c0_9 = arith.constant 0 : index
    %10 = vector.load %arg3[%c0_8, %c0_9] : memref<8x1xf32, #tpu.memory_space<vmem>>, vector<8x1xf32>
    %11 = arith.mulf %3, %3 : vector<8x8x128xf32>
    %cst_10 = arith.constant dense<0.000000e+00> : vector<8x8xf32>
    %12 = vector.multi_reduction <add>, %11, %cst_10 [2] : vector<8x8x128xf32> to vector<8x8xf32>
    %13 = vector.shape_cast %12 : vector<8x8xf32> to vector<8x8x1xf32>
    %cst_11 = arith.constant dense<0.000000e+00> : vector<8x1xf32>
    %14 = vector.multi_reduction <add>, %13, %cst_11 [0] : vector<8x8x1xf32> to vector<8x1xf32>
    %15 = arith.addf %10, %14 : vector<8x1xf32>
    %c0_12 = arith.constant 0 : index
    %c0_13 = arith.constant 0 : index
    %16 = vector.load %arg3[%c0_12, %c0_13] : memref<8x1xf32, #tpu.memory_space<vmem>>, vector<8x1xf32>
    tpu.vector_store %arg3[%c0_12, %c0_13], %15 {strides = array<i32>} : memref<8x1xf32, #tpu.memory_space<vmem>>, vector<8x1xf32>,
    return
  }
  func.func @transform_0(%arg0: i32) -> (i32, i32, i32) {
    %c0_i32 = arith.constant 0 : i32
    %c0_i32_0 = arith.constant 0 : i32
    %c0_i32_1 = arith.constant 0 : i32
    return %arg0, %c0_i32, %c0_i32_0 : i32, i32, i32
  }
  func.func @transform_1(%arg0: i32) -> (i32, i32) {
    %c0_i32 = arith.constant 0 : i32
    %c0_i32_0 = arith.constant 0 : i32
    %c0_i32_1 = arith.constant 0 : i32
    return %c0_i32, %c0_i32_0 : i32, i32
  }
  func.func @transform_2(%arg0: i32) -> (i32, i32) {
    %c0_i32 = arith.constant 0 : i32
    %c0_i32_0 = arith.constant 0 : i32
    %c0_i32_1 = arith.constant 0 : i32
    return %c0_i32, %c0_i32_0 : i32, i32
  }
}

</mosaic_0001>

<bundles_post_ra>
// kernel: tpu_custom_call.1
= control target key start
LH: loop header
LB: loop body
LE: loop exit
PB: predicated region body
PF: predicated region fallthrough
CT: control target
= control target key end

     0   :  { %8 = vsyncpa [#allocation3], 0  ;;  %s137_s9 = smov [#allocation2]   ;;  %s190_s0 = inlined_call_operand.hbm [shape: f32[8,8,128], index: 0, kind: input, shape index: {}]   ;;  %s191_s1 = inlined_call_operand.vmem [shape: f32[8,1], index: 1, kind: output, shape index: {0}]   ;;  %s192_s2 = inlined_call_operand.vmem [shape: f32[8,1], index: 2, kind: output, shape index: {1}]  }
   0x1   :  { %s14_s10 = sshll.u32 %s137_s9, 4  ;;  %s113_s13 = scalar_lea.hbm %s190_s0, 1024  ;;  %s15_s10 = int_to_ptr.vmem [resolvable:$true] %s14_s10 }
   0x2   :  { %p114_p0 = scmp.ne.s32.totalorder %s190_s0, %s113_s13  ;;  %p117_p1 = scmp.lt.u32.totalorder %s113_s13, %s190_s0 }
   0x4   :  { %p119_p2 = pnand %p117_p1, %p114_p0 }
   0x6   :  { %122 = shalt.err (!%p119_p2)
}
   0x7   :  { %s123_s18 = scalar_lea.vmem %s15_s10, 1024  ;;  %p128_p4 = scmp.lt.s32.totalorder %s15_s10, %s15_s10 }
   0x8   :  { %p124_p3 = scmp.ne.s32.totalorder %s15_s10, %s123_s18  ;;  %p129_p5 = scmp.lt.s32.totalorder %s123_s18, %s123_s18 }
   0xa   :  { %p130_p6 = por %p129_p5, %p128_p4 }
   0xc   :  { %p131_p7 = pnand %p130_p6, %p124_p3 }
   0xe   :  { %134 = shalt.err (!%p131_p7)
}
   0xf   :  { %s138_s19 = smov 128   ;;  %s139_s20 = smov 8  }
  0x10   :  { %20 = dma.hbm_to_vmem [thread:$0]  %s190_s0, 1024, %s15_s10, [#allocation3], %s138_s19, %s138_s19, %s139_s20  }
  0x11   :  { %135 = dma.done.wait [#allocation3], 1024  }
  0x12   :  { %136 = vsyncadd [#allocation3], 4294966272  ;;  %v31_v0 = vld [vmem:[#allocation2] sm:$0xff]  ;;  %v32_v1 = vld [vmem:[#allocation2 + $0x8] sm:$0xff]  ;;  %vm28_vm0 = vcmask 7168   ;;  %v140_v16 = vmov 0.0  }
  0x13   :  { %40 = vadd.xlane.f32.xlu0 %v31_v0  ;;  %v67_v2 = vmul.f32 %v31_v0, %v31_v0  ;;  %v68_v3 = vmul.f32 %v32_v1, %v32_v1  ;;  %v33_v4 = vld [vmem:[#allocation2 + $0x10] sm:$0xff]  ;;  %v34_v6 = vld [vmem:[#allocation2 + $0x18] sm:$0xff]  ;;  %v35_v8 = vld [vmem:[#allocation2 + $0x20] sm:$0xff]  ;;  %29 = vst.msk [vmem:[%s191_s1] sm:$0xff] %vm28_vm0, %v140_v16 }
  0x14   :  { %v69_v5 = vmul.f32 %v33_v4, %v33_v4  ;;  %v70_v7 = vmul.f32 %v34_v6, %v34_v6  ;;  %v71_v9 = vmul.f32 %v35_v8, %v35_v8  ;;  %v36_v10 = vld [vmem:[#allocation2 + $0x28] sm:$0xff]  ;;  %v37_v12 = vld [vmem:[#allocation2 + $0x30] sm:$0xff]  ;;  %v38_v14 = vld [vmem:[#allocation2 + $0x38] sm:$0xff]  ;;  %30 = vst.msk [vmem:[%s192_s2] sm:$0xff] %vm28_vm0, %v140_v16 }
  0x15   :  { %75 = vadd.xlane.f32.xlu1 %v67_v2  ;;  %v72_v11 = vmul.f32 %v36_v10, %v36_v10  ;;  %v73_v13 = vmul.f32 %v37_v12, %v37_v12  ;;  %v74_v15 = vmul.f32 %v38_v14, %v38_v14 }
  0x17   :  { %42 = vadd.xlane.f32.xlu0 %v32_v1 }
  0x19   :  { %77 = vadd.xlane.f32.xlu1 %v68_v3 }
  0x1a   :  { %v39_v43 = vld [vmem:[%s191_s1] sm:$0xff] }
  0x1b   :  { %44 = vadd.xlane.f32.xlu0 %v33_v4  ;;  %v66_v47 = vld [vmem:[%s192_s2] sm:$0xff] }
  0x1d   :  { %79 = vadd.xlane.f32.xlu1 %v69_v5 }
  0x1f   :  { %46 = vadd.xlane.f32.xlu0 %v34_v6 }
  0x21   :  { %81 = vadd.xlane.f32.xlu1 %v70_v7 }
  0x23   :  { %48 = vadd.xlane.f32.xlu0 %v35_v8 }
  0x25   :  { %83 = vadd.xlane.f32.xlu1 %v71_v9 }
  0x27   :  { %50 = vadd.xlane.f32.xlu0 %v36_v10 }
  0x29   :  { %85 = vadd.xlane.f32.xlu1 %v72_v11 }
  0x2b   :  { %52 = vadd.xlane.f32.xlu0 %v37_v12 }
  0x2d   :  { %87 = vadd.xlane.f32.xlu1 %v73_v13 }
  0x2f   :  { %54 = vadd.xlane.f32.xlu0 %v38_v14 }
  0x31   :  { %89 = vadd.xlane.f32.xlu1 %v74_v15 }
  0xa0   :  { %v41_v17 = vpop.xlane.xlu0 %40 }
  0xa2   :  { %v76_v18 = vpop.xlane.xlu1 %75 }
  0xa4   :  { %v43_v19 = vpop.xlane.xlu0 %42 }
  0xa5   :  { %v56_v26 = vadd.f32 %v43_v19, %v41_v17 }
  0xa6   :  { %v78_v20 = vpop.xlane.xlu1 %77 }
  0xa7   :  { %v91_v28 = vadd.f32 %v78_v20, %v76_v18 }
  0xa8   :  { %v45_v21 = vpop.xlane.xlu0 %44 }
  0xa9   :  { %v57_v29 = vadd.f32 %v56_v26, %v45_v21 }
  0xaa   :  { %v80_v22 = vpop.xlane.xlu1 %79 }
  0xab   :  { %v92_v31 = vadd.f32 %v91_v28, %v80_v22 }
  0xac   :  { %v47_v23 = vpop.xlane.xlu0 %46 }
  0xad   :  { %v58_v32 = vadd.f32 %v57_v29, %v47_v23 }
  0xae   :  { %v82_v24 = vpop.xlane.xlu1 %81 }
  0xaf   :  { %v93_v34 = vadd.f32 %v92_v31, %v82_v24 }
  0xb0   :  { %v49_v25 = vpop.xlane.xlu0 %48 }
  0xb1   :  { %v59_v35 = vadd.f32 %v58_v32, %v49_v25 }
  0xb2   :  { %v84_v27 = vpop.xlane.xlu1 %83 }
  0xb3   :  { %v94_v37 = vadd.f32 %v93_v34, %v84_v27 }
  0xb4   :  { %v51_v30 = vpop.xlane.xlu0 %50 }
  0xb5   :  { %v60_v38 = vadd.f32 %v59_v35, %v51_v30 }
  0xb6   :  { %v86_v33 = vpop.xlane.xlu1 %85 }
  0xb7   :  { %v95_v40 = vadd.f32 %v94_v37, %v86_v33 }
  0xb8   :  { %v53_v36 = vpop.xlane.xlu0 %52 }
  0xb9   :  { %v61_v41 = vadd.f32 %v60_v38, %v53_v36 }
  0xba   :  { %v88_v39 = vpop.xlane.xlu1 %87 }
  0xbb   :  { %v96_v44 = vadd.f32 %v95_v40, %v88_v39 }
  0xbc   :  { %v55_v42 = vpop.xlane.xlu0 %54 }
  0xbd   :  { %v62_v45 = vadd.f32 %v61_v41, %v55_v42 }
  0xbe   :  { %v90_v46 = vpop.xlane.xlu1 %89 }
  0xbf   :  { %v63_v48 = vadd.f32 %v62_v45, %v39_v43  ;;  %v97_v49 = vadd.f32 %v96_v44, %v90_v46 }
  0xc1   :  { %65 = vst.msk [vmem:[%s191_s1] sm:$0xff] %vm28_vm0, %v63_v48  ;;  %v98_v50 = vadd.f32 %v97_v49, %v66_v47 }
  0xc3   :  { %99 = vst.msk [vmem:[%s192_s2] sm:$0xff] %vm28_vm0, %v98_v50 }
  0xc4   :  { %108 = vsyncpa [#allocation3], 1 }

</bundles_post_ra>
